<compile_context>
chip_gen: v5e
topology: v5e:2x2
jax: 0.10.0
libtpu: 0.0.40
codegen_flags: <defaults>
</compile_context>

<pallas_src>
import jax
import jax.numpy as jnp
from jax.experimental import pallas as pl
from jax.experimental.pallas import tpu as pltpu

TAU = 2.0
V_THRESHOLD = 1.0
V_RESET = 0.0
IN_FEATURES = 28 * 28          # 784 (full minor dim of x -> no K padding needed)
OUT_FEATURES = 10
OUT_PAD = 128                  # output lanes padded to one full lane width
# spike = (v >= v_th)  <=>  (h >= tau * (v_th - v_reset));  exact for tau = 2.0.
FIRE_THRESHOLD = TAU * (V_THRESHOLD - V_RESET)


def _round_up(x: int, m: int) -> int:
    return ((x + m - 1) // m) * m


def _snn_kernel(x_ref, wt_ref, spike_ref):
    # One MXU matmul per batch tile; LIF charge + fire fused into a single
    # VPU compare (h >= tau*(v_th - v_reset)), written as lane-dense int8.
    h = jnp.dot(x_ref[...], wt_ref[...], preferred_element_type=jnp.float32)
    spike_ref[...] = (h >= FIRE_THRESHOLD).astype(spike_ref.dtype)


def snn_forward(x_nchw: jax.Array, weight: jax.Array, *, tile_m: int = 4096) -> jax.Array:
    """x_nchw: [N, 1, 28, 28]; weight: [10, 784] (PyTorch nn.Linear layout).

    Returns spike [N, 10] float32, matching SNN.forward(x)."""
    n = x_nchw.shape[0]
    x_flat = x_nchw.reshape(n, IN_FEATURES)          # free view (contiguous)

    # Batch tile: multiple of 8 sublanes; never larger than needed.
    tm = _round_up(max(8, min(tile_m, _round_up(n, 8))), 8)
    grid_m = pl.cdiv(n, tm)
    n_out = grid_m * tm                              # padded output rows -> all out blocks full

    # Only the tiny weight is padded/transposed (~0.4 MiB one-time glue).
    wt_pad = jnp.pad(
        weight.astype(x_flat.dtype).T,
        ((0, 0), (0, OUT_PAD - OUT_FEATURES)),
    )                                                # [784, 128]

    x_itemsize = jnp.dtype(x_flat.dtype).itemsize
    w_itemsize = jnp.dtype(wt_pad.dtype).itemsize
    vmem_limit = int(
        2 * tm * IN_FEATURES * x_itemsize            # double-buffered x tiles
        + 2 * tm * OUT_PAD                           # double-buffered int8 spike tiles
        + 2 * IN_FEATURES * OUT_PAD * w_itemsize     # resident weight buffers
    ) + (4 << 20)                                    # headroom for compiler scratch

    spike_pad = pl.pallas_call(
        _snn_kernel,
        out_shape=jax.ShapeDtypeStruct((n_out, OUT_PAD), jnp.int8),
        grid=(grid_m,),
        in_specs=[
            # x: one (tm, 784) tile per grid step -> double-buffered DMA, no padding.
            pl.BlockSpec((tm, IN_FEATURES), lambda i: (i, 0)),
            # weight: constant block index -> DMA'd once, stays resident in VMEM.
            pl.BlockSpec((IN_FEATURES, OUT_PAD), lambda i: (0, 0)),
        ],
        out_specs=pl.BlockSpec((tm, OUT_PAD), lambda i: (i, 0)),
        compiler_params=pltpu.CompilerParams(
            dimension_semantics=("parallel",),       # megacore sharding on v7x
            vmem_limit_bytes=vmem_limit,
        ),
    )(x_flat, wt_pad)

    # Strip batch padding + dead output lanes, then restore float32 spikes.
    return spike_pad[:n, :OUT_FEATURES].astype(jnp.float32)


def snn_reference(x_nchw, weight):
    x_flat = x_nchw.reshape(x_nchw.shape[0], IN_FEATURES).astype(jnp.float32)
    h = x_flat @ weight.astype(jnp.float32).T
    v = V_RESET + (h - (V_RESET - V_RESET)) / TAU    # decay_input=True charge
    return (v >= V_THRESHOLD).astype(jnp.float32)


if __name__ == "__main__":
    key = jax.random.PRNGKey(0)
    k_x, k_w = jax.random.split(key)

    batch = 2
    # MNIST-shaped input, NCHW.  Scale chosen so both spiking and silent
    # neurons appear (exercises both sides of the threshold).
    x = jax.random.uniform(k_x, (batch, 1, 28, 28), dtype=jnp.float32,
                           minval=0.0, maxval=6.0)

    # nn.Linear default init: U(-1/sqrt(fan_in), 1/sqrt(fan_in)).
    bound = 1.0 / (IN_FEATURES ** 0.5)
    weight = jax.random.uniform(
        k_w, (OUT_FEATURES, IN_FEATURES), dtype=jnp.float32,
        minval=-bound, maxval=bound,
    )

    fwd = jax.jit(snn_forward)
    spike = jax.block_until_ready(fwd(x, weight))

    spike_ref = snn_reference(x, weight)
    assert spike.shape == (batch, OUT_FEATURES)
    assert spike.dtype == jnp.float32
    assert bool(jnp.array_equal(spike, spike_ref)), "spike mismatch vs reference"

    print("KERNEL_OK")
</pallas_src>

<mosaic_0001>
module attributes {stable_mosaic.version = 11 : i64} {
  func.func @_snn_kernel(%arg0: i32, %arg1: memref<8x784xf32, #tpu.memory_space<vmem>>, %arg2: memref<784x128xf32, #tpu.memory_space<vmem>>, %arg3: memref<8x128xi8, #tpu.memory_space<vmem>>) attributes {dimension_semantics = [#tpu.dimension_semantics<parallel>], iteration_bounds = array<i64: 1>, scalar_prefetch = 0 : i64, scratch_operands = 0 : i64, tpu.core_type = #tpu.core_type<tc>, window_params = [{transform_indices = @transform_0, window_bounds = array<i64: 8, 784>}, {pipeline_mode = #tpu.pipeline_mode<synchronous>, transform_indices = @transform_1, window_bounds = array<i64: 784, 128>}, {transform_indices = @transform_2, window_bounds = array<i64: 8, 128>}]} {
    %c0 = arith.constant 0 : index
    %c0_0 = arith.constant 0 : index
    %0 = vector.load %arg1[%c0, %c0_0] : memref<8x784xf32, #tpu.memory_space<vmem>>, vector<8x784xf32>
    %c0_1 = arith.constant 0 : index
    %c0_2 = arith.constant 0 : index
    %1 = vector.load %arg2[%c0_1, %c0_2] : memref<784x128xf32, #tpu.memory_space<vmem>>, vector<784x128xf32>
    %cst = arith.constant dense<0.000000e+00> : vector<8x128xf32>
    %2 = tpu.matmul %0, %1, %cst {dimension_numbers = #tpu.dot_dimension_numbers<[1], [0], [0], [1], [0, 0, 1, 1], [], []>} : vector<8x784xf32>, vector<784x128xf32>, vector<8x128xf32> -> vector<8x128xf32>
    %cst_3 = arith.constant 2.000000e+00 : f32
    %3 = vector.broadcast %cst_3 : f32 to vector<8x128xf32>
    %4 = arith.cmpf oge, %2, %3 : vector<8x128xf32>
    %5 = arith.extui %4 : vector<8x128xi1> to vector<8x128xi8>
    %c0_4 = arith.constant 0 : index
    %c0_5 = arith.constant 0 : index
    %6 = vector.load %arg3[%c0_4, %c0_5] : memref<8x128xi8, #tpu.memory_space<vmem>>, vector<8x128xi8>
    tpu.vector_store %arg3[%c0_4, %c0_5], %5 {strides = array<i32>} : memref<8x128xi8, #tpu.memory_space<vmem>>, vector<8x128xi8>,
    return
  }
  func.func @transform_0(%arg0: i32) -> (i32, i32) {
    %c0_i32 = arith.constant 0 : i32
    %c0_i32_0 = arith.constant 0 : i32
    return %arg0, %c0_i32 : i32, i32
  }
  func.func @transform_1(%arg0: i32) -> (i32, i32) {
    %c0_i32 = arith.constant 0 : i32
    %c0_i32_0 = arith.constant 0 : i32
    %c0_i32_1 = arith.constant 0 : i32
    return %c0_i32, %c0_i32_0 : i32, i32
  }
  func.func @transform_2(%arg0: i32) -> (i32, i32) {
    %c0_i32 = arith.constant 0 : i32
    %c0_i32_0 = arith.constant 0 : i32
    return %arg0, %c0_i32 : i32, i32
  }
}

</mosaic_0001>

<bundles_post_ra>
// kernel: snn_forward.1
= control target key start
LH: loop header
LB: loop body
LE: loop exit
PB: predicated region body
PF: predicated region fallthrough
CT: control target
= control target key end

     0   :  { %vm155_vm0 = vcmask 130048   ;;  %s649_s1 = inlined_call_operand.vmem [shape: f32[784,128], index: 1, kind: input, shape index: {}]   ;;  %s650_s0 = inlined_call_operand.vmem [shape: f32[2,784], index: 0, kind: input, shape index: {}]   ;;  %s651_s2 = inlined_call_operand.vmem [shape: s8[8,128], index: 2, kind: output, shape index: {}]  }
   0x1   :  { %v36_v0 = vld [vmem:[%s649_s1 + $0x78] sm:$0xff]  ;;  %v35_v1 = vld [vmem:[%s649_s1 + $0x70] sm:$0xff]  ;;  %v34_v4 = vld [vmem:[%s649_s1 + $0x68] sm:$0xff] }
   0x2   :  { %v52_v2 = vld [vmem:[%s649_s1 + $0xf8] sm:$0xff]  ;;  %158 = vmatpush.msra.mxu0 %v36_v0  ;;  %v51_v3 = vld [vmem:[%s649_s1 + $0xf0] sm:$0xff]  ;;  %v50_v5 = vld [vmem:[%s649_s1 + $0xe8] sm:$0xff] }
   0x3   :  { %178 = vmatpush.msra.mxu1 %v52_v2  ;;  %v33_v6 = vld [vmem:[%s649_s1 + $0x60] sm:$0xff]  ;;  %v32_v8 = vld [vmem:[%s649_s1 + $0x58] sm:$0xff]  ;;  %v67_v11 = vld [vmem:[%s649_s1 + $0x170] sm:$0xff] }
   0x4   :  { %159 = vmatpush.msra.mxu0 %v35_v1  ;;  %v49_v7 = vld [vmem:[%s649_s1 + $0xe0] sm:$0xff]  ;;  %v48_v9 = vld [vmem:[%s649_s1 + $0xd8] sm:$0xff]  ;;  %v31_v13 = vld [vmem:[%s649_s1 + $0x50] sm:$0xff] }
   0x5   :  { %179 = vmatpush.msra.mxu1 %v51_v3  ;;  %v68_v10 = vld [vmem:[%s649_s1 + $0x178] sm:$0xff]  ;;  %v47_v14 = vld [vmem:[%s649_s1 + $0xd0] sm:$0xff]  ;;  %v66_v15 = vld [vmem:[%s649_s1 + $0x168] sm:$0xff] }
   0x6   :  { %160 = vmatpush.msra.mxu0 %v34_v4  ;;  %v84_v12 = vld [vmem:[%s649_s1 + $0x1f8] sm:$0xff]  ;;  %198 = vmatpush.msra.mxu2 %v68_v10  ;;  %v83_v16 = vld [vmem:[%s649_s1 + $0x1f0] sm:$0xff]  ;;  %v30_v17 = vld [vmem:[%s649_s1 + $0x48] sm:$0xff] }
   0x7   :  { %180 = vmatpush.msra.mxu1 %v50_v5  ;;  %218 = vmatpush.msra.mxu3 %v84_v12  ;;  %v46_v18 = vld [vmem:[%s649_s1 + $0xc8] sm:$0xff]  ;;  %v65_v20 = vld [vmem:[%s649_s1 + $0x160] sm:$0xff]  ;;  %v64_v24 = vld [vmem:[%s649_s1 + $0x158] sm:$0xff] }
   0x8   :  { %161 = vmatpush.msra.mxu0 %v33_v6  ;;  %199 = vmatpush.msra.mxu2 %v67_v11  ;;  %v82_v19 = vld [vmem:[%s649_s1 + $0x1e8] sm:$0xff]  ;;  %v81_v21 = vld [vmem:[%s649_s1 + $0x1e0] sm:$0xff]  ;;  %v80_v25 = vld [vmem:[%s649_s1 + $0x1d8] sm:$0xff] }
   0x9   :  { %181 = vmatpush.msra.mxu1 %v49_v7  ;;  %219 = vmatpush.msra.mxu3 %v83_v16  ;;  %v29_v22 = vld [vmem:[%s649_s1 + $0x40] sm:$0xff]  ;;  %v28_v26 = vld [vmem:[%s649_s1 + $0x38] sm:$0xff]  ;;  %v63_v28 = vld [vmem:[%s649_s1 + $0x150] sm:$0xff] }
   0xa   :  { %162 = vmatpush.msra.mxu0 %v32_v8  ;;  %v45_v23 = vld [vmem:[%s649_s1 + $0xc0] sm:$0xff]  ;;  %200 = vmatpush.msra.mxu2 %v66_v15  ;;  %v44_v27 = vld [vmem:[%s649_s1 + $0xb8] sm:$0xff]  ;;  %v79_v29 = vld [vmem:[%s649_s1 + $0x1d0] sm:$0xff] }
   0xb   :  { %182 = vmatpush.msra.mxu1 %v48_v9  ;;  %220 = vmatpush.msra.mxu3 %v82_v19  ;;  %v27_v30 = vld [vmem:[%s649_s1 + $0x30] sm:$0xff]  ;;  %v62_v32 = vld [vmem:[%s649_s1 + $0x148] sm:$0xff]  ;;  %v61_v36 = vld [vmem:[%s649_s1 + $0x140] sm:$0xff] }
   0xc   :  { %163 = vmatpush.msra.mxu0 %v31_v13  ;;  %201 = vmatpush.msra.mxu2 %v65_v20  ;;  %v43_v31 = vld [vmem:[%s649_s1 + $0xb0] sm:$0xff]  ;;  %v78_v33 = vld [vmem:[%s649_s1 + $0x1c8] sm:$0xff]  ;;  %v77_v37 = vld [vmem:[%s649_s1 + $0x1c0] sm:$0xff] }
   0xd   :  { %183 = vmatpush.msra.mxu1 %v47_v14  ;;  %221 = vmatpush.msra.mxu3 %v81_v21  ;;  %v26_v34 = vld [vmem:[%s649_s1 + $0x28] sm:$0xff]  ;;  %v25_v38 = vld [vmem:[%s649_s1 + $0x20] sm:$0xff]  ;;  %v60_v40 = vld [vmem:[%s649_s1 + $0x138] sm:$0xff] }
   0xe   :  { %164 = vmatpush.msra.mxu0 %v30_v17  ;;  %202 = vmatpush.msra.mxu2 %v64_v24  ;;  %v42_v35 = vld [vmem:[%s649_s1 + $0xa8] sm:$0xff]  ;;  %v41_v39 = vld [vmem:[%s649_s1 + $0xa0] sm:$0xff]  ;;  %v76_v41 = vld [vmem:[%s649_s1 + $0x1b8] sm:$0xff] }
   0xf   :  { %184 = vmatpush.msra.mxu1 %v46_v18  ;;  %222 = vmatpush.msra.mxu3 %v80_v25  ;;  %v24_v42 = vld [vmem:[%s649_s1 + $0x18] sm:$0xff]  ;;  %v59_v44 = vld [vmem:[%s649_s1 + $0x130] sm:$0xff]  ;;  %v22_v48 = vld [vmem:[%s649_s1 + $0x8] sm:$0xff] }
  0x10   :  { %165 = vmatpush.msra.mxu0 %v29_v22  ;;  %203 = vmatpush.msra.mxu2 %v63_v28  ;;  %v40_v43 = vld [vmem:[%s649_s1 + $0x98] sm:$0xff]  ;;  %v75_v45 = vld [vmem:[%s649_s1 + $0x1b0] sm:$0xff]  ;;  %v58_v49 = vld [vmem:[%s649_s1 + $0x128] sm:$0xff] }
  0x11   :  { %185 = vmatpush.msra.mxu1 %v45_v23  ;;  %223 = vmatpush.msra.mxu3 %v79_v29  ;;  %v23_v46 = vld [vmem:[%s649_s1 + $0x10] sm:$0xff]  ;;  %v74_v50 = vld [vmem:[%s649_s1 + $0x1a8] sm:$0xff]  ;;  %v21_v51 = vld [vmem:[%s649_s1] sm:$0xff] }
  0x12   :  { %166 = vmatpush.msra.mxu0 %v28_v26  ;;  %204 = vmatpush.msra.mxu2 %v62_v32  ;;  %v39_v47 = vld [vmem:[%s649_s1 + $0x90] sm:$0xff]  ;;  %v38_v52 = vld [vmem:[%s649_s1 + $0x88] sm:$0xff]  ;;  %v57_v53 = vld [vmem:[%s649_s1 + $0x120] sm:$0xff] }
  0x13   :  { %186 = vmatpush.msra.mxu1 %v44_v27  ;;  %224 = vmatpush.msra.mxu3 %v78_v33  ;;  %v73_v54 = vld [vmem:[%s649_s1 + $0x1a0] sm:$0xff]  ;;  %v15_v56 = vld [vmem:[%s650_s0 + $0xe] sm:$0xff]  ;;  %v100_v60 = vld [vmem:[%s649_s1 + $0x278] sm:$0xff] }
  0x14   :  { %167 = vmatpush.msra.mxu0 %v27_v30  ;;  %205 = vmatpush.msra.mxu2 %v61_v36  ;;  %v13_v55 = vld [vmem:[%s650_s0] sm:$0xff]  ;;  %v19_v59 = vld [vmem:[%s650_s0 + $0x2a] sm:$0xff]  ;;  %v116_v61 = vld [vmem:[%s649_s1 + $0x2f8] sm:$0xff]  ;;  %129 = vst [vmem:[#allocation1 + $0x1] ss:$4 sm:$0xff] %v15_v56 }
  0x15   :  { %187 = vmatpush.msra.mxu1 %v43_v31  ;;  %225 = vmatpush.msra.mxu3 %v77_v37  ;;  %v37_v57 = vld [vmem:[%s649_s1 + $0x80] sm:$0xff]  ;;  %127 = vst [vmem:[#allocation1] ss:$4 sm:$0xff] %v13_v55  ;;  %v56_v62 = vld [vmem:[%s649_s1 + $0x118] sm:$0xff]  ;;  %v99_v0 = vld [vmem:[%s649_s1 + $0x270] sm:$0xff] }
  0x16   :  { %168 = vmatpush.msra.mxu0 %v26_v34  ;;  %206 = vmatpush.msra.mxu2 %v60_v40  ;;  %v17_v58 = vld [vmem:[%s650_s0 + $0x1c] sm:$0xff]  ;;  %v98_v1 = vld [vmem:[%s649_s1 + $0x268] sm:$0xff]  ;;  %v115_v2 = vld [vmem:[%s649_s1 + $0x2f0] sm:$0xff]  ;;  %133 = vst [vmem:[#allocation1 + $0x3] ss:$4 sm:$0xff] %v19_v59 }
  0x17   :  { %188 = vmatpush.msra.mxu1 %v42_v35  ;;  %226 = vmatpush.msra.mxu3 %v76_v41  ;;  %v72_v63 = vld [vmem:[%s649_s1 + $0x198] sm:$0xff]  ;;  %131 = vst [vmem:[#allocation1 + $0x2] ss:$4 sm:$0xff] %v17_v58  ;;  %v114_v3 = vld [vmem:[%s649_s1 + $0x2e8] sm:$0xff]  ;;  %v55_v4 = vld [vmem:[%s649_s1 + $0x110] sm:$0xff] }
  0x18   :  { %169 = vmatpush.msra.mxu0 %v25_v38  ;;  %207 = vmatpush.msra.mxu2 %v59_v44  ;;  %v71_v5 = vld [vmem:[%s649_s1 + $0x190] sm:$0xff]  ;;  %v14_v6 = vld [vmem:[%s650_s0 + $0x8] sm:$0x3f]  ;;  %v97_v12 = vld [vmem:[%s649_s1 + $0x260] sm:$0xff] }
  0x19   :  { %189 = vmatpush.msra.mxu1 %v41_v39  ;;  %227 = vmatpush.msra.mxu3 %v75_v45  ;;  %v16_v7 = vld [vmem:[%s650_s0 + $0x16] sm:$0x3f]  ;;  %v18_v8 = vld [vmem:[%s650_s0 + $0x24] sm:$0x3f]  ;;  %135 = vst [vmem:[#allocation1 + $0x20] ss:$4 sm:$0xff] %v14_v6 }
  0x1a   :  { %170 = vmatpush.msra.mxu0 %v24_v42  ;;  %208 = vmatpush.msra.mxu2 %v58_v49  ;;  %v54_v9 = vld [vmem:[%s649_s1 + $0x108] sm:$0xff]  ;;  %v20_v11 = vld [vmem:[%s650_s0 + $0x32] sm:$0x3f]  ;;  %v113_v13 = vld [vmem:[%s649_s1 + $0x2e0] sm:$0xff]  ;;  %137 = vst [vmem:[#allocation1 + $0x21] ss:$4 sm:$0xff] %v16_v7 }
  0x1b   :  { %190 = vmatpush.msra.mxu1 %v40_v43  ;;  %228 = vmatpush.msra.mxu3 %v74_v50  ;;  %v70_v10 = vld [vmem:[%s649_s1 + $0x188] sm:$0xff]  ;;  %v53_v14 = vld [vmem:[%s649_s1 + $0x100] sm:$0xff]  ;;  %139 = vst [vmem:[#allocation1 + $0x22] ss:$4 sm:$0xff] %v18_v8  ;;  %v96_v16 = vld [vmem:[%s649_s1 + $0x258] sm:$0xff] }
  0x1c   :  { %171 = vmatpush.msra.mxu0 %v23_v46  ;;  %209 = vmatpush.msra.mxu2 %v57_v53  ;;  %v69_v15 = vld [vmem:[%s649_s1 + $0x180] sm:$0xff]  ;;  %v112_v17 = vld [vmem:[%s649_s1 + $0x2d8] sm:$0xff]  ;;  %141 = vst [vmem:[#allocation1 + $0x23] ss:$4 sm:$0xff] %v20_v11  ;;  %v95_v20 = vld [vmem:[%s649_s1 + $0x250] sm:$0xff] }
  0x1d   :  { %191 = vmatpush.msra.mxu1 %v39_v47  ;;  %229 = vmatpush.msra.mxu3 %v73_v54  ;;  %v111_v21 = vld [vmem:[%s649_s1 + $0x2d0] sm:$0xff]  ;;  %v118_v22 = vld [vmem:[%s649_s1 + $0x308] sm:$0xff]  ;;  %v117_v27 = vld [vmem:[%s649_s1 + $0x300] sm:$0xff] }
  0x1e   :  { %172 = vmatpush.msra.mxu0 %v22_v48  ;;  %210 = vmatpush.msra.mxu2 %v56_v62  ;;  %v144_v18 = vld.sshfl [vmem:[#allocation1 + $0x10] sm:$0xff pattern:$0x73625140]  ;;  %v145_v19 = vld.sshfl [vmem:[#allocation1 + $0x18] sm:$0xff pattern:$0x73625140] }
  0x1f   :  { %192 = vmatpush.msra.mxu1 %v38_v52  ;;  %230 = vmatpush.msra.mxu3 %v72_v63  ;;  %v142_v23 = vld.sshfl [vmem:[#allocation1] sm:$0xff pattern:$0x73625140]  ;;  %v94_v24 = vld [vmem:[%s649_s1 + $0x248] sm:$0xff]  ;;  %v92_v30 = vld [vmem:[%s649_s1 + $0x238] sm:$0xff]  ;;  %v312_v62 = vmov 0  }
  0x20   :  { %173 = vmatpush.msra.mxu0 %v21_v51  ;;  %211 = vmatpush.msra.mxu2 %v55_v4  ;;  %v110_v25 = vld [vmem:[%s649_s1 + $0x2c8] sm:$0xff]  ;;  %v93_v28 = vld [vmem:[%s649_s1 + $0x240] sm:$0xff]  ;;  %v108_v31 = vld [vmem:[%s649_s1 + $0x2b8] sm:$0xff] }
  0x21   :  { %193 = vmatpush.msra.mxu1 %v37_v57  ;;  %231 = vmatpush.msra.mxu3 %v71_v5  ;;  %v143_v26 = vld.sshfl [vmem:[#allocation1 + $0x8] sm:$0xff pattern:$0x73625140]  ;;  %v109_v29 = vld [vmem:[%s649_s1 + $0x2c0] sm:$0xff]  ;;  %v91_v33 = vld [vmem:[%s649_s1 + $0x230] sm:$0xff] }
  0x22   :  { %238 = vmatpush.msrb.mxu0 %v100_v60  ;;  %212 = vmatpush.msra.mxu2 %v54_v9  ;;  %v107_v34 = vld [vmem:[%s649_s1 + $0x2b0] sm:$0xff]  ;;  %v90_v35 = vld [vmem:[%s649_s1 + $0x228] sm:$0xff]  ;;  %v89_v37 = vld [vmem:[%s649_s1 + $0x220] sm:$0xff] }
  0x23   :  { %258 = vmatpush.msrb.mxu1 %v116_v61  ;;  %232 = vmatpush.msra.mxu3 %v70_v10  ;;  %v148_v32 = vld.sshfl [vmem:[#allocation1 + $0x30] sm:$0xff pattern:$0x73625140]  ;;  %v106_v36 = vld [vmem:[%s649_s1 + $0x2a8] sm:$0xff]  ;;  %v105_v38 = vld [vmem:[%s649_s1 + $0x2a0] sm:$0xff] }
  0x24   :  { %239 = vmatpush.msrb.mxu0 %v99_v0  ;;  %213 = vmatpush.msra.mxu2 %v53_v14  ;;  %v88_v39 = vld [vmem:[%s649_s1 + $0x218] sm:$0xff]  ;;  %v87_v41 = vld [vmem:[%s649_s1 + $0x210] sm:$0xff]  ;;  %v86_v43 = vld [vmem:[%s649_s1 + $0x208] sm:$0xff] }
  0x25   :  { %259 = vmatpush.msrb.mxu1 %v115_v2  ;;  %233 = vmatpush.msra.mxu3 %v69_v15  ;;  %v104_v40 = vld [vmem:[%s649_s1 + $0x298] sm:$0xff]  ;;  %v103_v42 = vld [vmem:[%s649_s1 + $0x290] sm:$0xff]  ;;  %v102_v44 = vld [vmem:[%s649_s1 + $0x288] sm:$0xff] }
  0x26   :  { %240 = vmatpush.msrb.mxu0 %v98_v1  ;;  %214 = vmatmul.f32.vlgmr.msra.gmra.mxu2 %v144_v18  ;;  %v85_v45 = vld [vmem:[%s649_s1 + $0x200] sm:$0xff]  ;;  %v147_v48 = vld.sshfl [vmem:[#allocation1 + $0x28] sm:$0xff pattern:$0x73625140] }
  0x27   :  { %260 = vmatpush.msrb.mxu1 %v114_v3  ;;  %234 = vmatmul.f32.vlgmr.msra.gmra.mxu3 %v145_v19  ;;  %v101_v46 = vld [vmem:[%s649_s1 + $0x280] sm:$0xff] }
  0x28   :  { %241 = vmatpush.msrb.mxu0 %v97_v12  ;;  %292 = vmatpush.msrb.mxu2 %v118_v22  ;;  %v146_v47 = vld.sshfl [vmem:[#allocation1 + $0x20] sm:$0xff pattern:$0x73625140] }
  0x29   :  { %261 = vmatpush.msrb.mxu1 %v113_v13  ;;  %174 = vmatmul.f32.vlgmr.msra.gmra.mxu0 %v142_v23 }
  0x2a   :  { %242 = vmatpush.msrb.mxu0 %v96_v16  ;;  %194 = vmatmul.f32.vlgmr.msra.gmra.mxu1 %v143_v26 }
  0x2b   :  { %262 = vmatpush.msrb.mxu1 %v112_v17  ;;  %293 = vmatpush.msrb.mxu2 %v117_v27 }
  0x2c   :  { %243 = vmatpush.msrb.mxu0 %v95_v20 }
  0x2d   :  { %263 = vmatpush.msrb.mxu1 %v111_v21 }
  0x2e   :  { %244 = vmatpush.msrb.mxu0 %v94_v24  ;;  %310 = vmatmul.msk.f32.vlgmr.msrb.gmra.mxu2 %vm155_vm0, %v148_v32 }
  0x2f   :  { %264 = vmatpush.msrb.mxu1 %v110_v25 }
  0x30   :  { %245 = vmatpush.msrb.mxu0 %v93_v28 }
  0x31   :  { %265 = vmatpush.msrb.mxu1 %v109_v29 }
  0x32   :  { %246 = vmatpush.msrb.mxu0 %v92_v30 }
  0x33   :  { %266 = vmatpush.msrb.mxu1 %v108_v31 }
  0x34   :  { %247 = vmatpush.msrb.mxu0 %v91_v33 }
  0x35   :  { %267 = vmatpush.msrb.mxu1 %v107_v34 }
  0x36   :  { %248 = vmatpush.msrb.mxu0 %v90_v35 }
  0x37   :  { %268 = vmatpush.msrb.mxu1 %v106_v36 }
  0x38   :  { %249 = vmatpush.msrb.mxu0 %v89_v37 }
  0x39   :  { %269 = vmatpush.msrb.mxu1 %v105_v38 }
  0x3a   :  { %250 = vmatpush.msrb.mxu0 %v88_v39 }
  0x3b   :  { %270 = vmatpush.msrb.mxu1 %v104_v40 }
  0x3c   :  { %251 = vmatpush.msrb.mxu0 %v87_v41 }
  0x3d   :  { %271 = vmatpush.msrb.mxu1 %v103_v42 }
  0x3e   :  { %252 = vmatpush.msrb.mxu0 %v86_v43 }
  0x3f   :  { %272 = vmatpush.msrb.mxu1 %v102_v44 }
  0x40   :  { %253 = vmatpush.msrb.mxu0 %v85_v45 }
  0x41   :  { %273 = vmatpush.msrb.mxu1 %v101_v46  ;;  %254 = vmatmul.f32.vlgmr.msrb.gmra.mxu0 %v146_v47 }
  0x42   :  { %274 = vmatmul.f32.vlgmr.msrb.gmra.mxu1 %v147_v48 }
  0xa6   :  { %v175_v49 = vpop.f32.mrf.mxu0 }
  0xa7   :  { %v195_v50 = vpop.f32.mrf.mxu1 }
  0xa8   :  { %v196_v51 = vadd.f32 %v195_v50, %v175_v49 }
  0xa9   :  { %v215_v52 = vpop.f32.mrf.mxu2 }
  0xaa   :  { %v216_v53 = vadd.f32 %v215_v52, %v196_v51  ;;  %v235_v54 = vpop.f32.mrf.mxu3 }
  0xac   :  { %v236_v55 = vadd.f32 %v235_v54, %v216_v53 }
  0xb1   :  { %v295_v59 = vpop.f32.mrf.mxu2 }
  0xbe   :  { %v255_v56 = vpop.f32.mrf.mxu0 }
  0xbf   :  { %v275_v57 = vpop.f32.mrf.mxu1  ;;  %v256_v58 = vadd.f32 %v255_v56, %v236_v55 }
  0xc1   :  { %v276_v60 = vadd.f32 %v275_v57, %v256_v58 }
  0xc3   :  { %v296_v61 = vadd.f32 %v295_v59, %v276_v60 }
  0xc5   :  { %vm298_vm1 = vcmp.ge.f32.partialorder %v296_v61, 2.0 }
  0xc6   :  { %vm299_vm2 = vmpackc.low %vm298_vm1, %vm298_vm1 }
  0xc7   :  { %v300_v63 = vsel %vm299_vm2, 16711935, %v312_v62 }
  0xc8   :  { %v302_v0 = vpack.c.b8 %v300_v63, %v300_v63 }
  0xca   :  { %vm303_vm3 = vnez %v302_v0 }
  0xcb   :  { %v304_v1 = vsel %vm303_vm3, 16843009, %v312_v62 }
  0xcc   :  { %305 = vst [vmem:[%s651_s2] sm:$0x3] %v304_v1 }

</bundles_post_ra>
